<compile_context>
chip_gen: v6e
topology: v6e:2x2x1
jax: 0.10.0
libtpu: 0.0.40
codegen_flags: <defaults>
</compile_context>

<pallas_src>
import functools
import math

import jax
import jax.numpy as jnp
from jax.experimental import pallas as pl
from jax.experimental.pallas import tpu as pltpu

_VMEM_LIMIT = 32 * 1024 * 1024   # safe on v5e/v6e (128 MiB) and v7x (64 MiB physical)


# ----------------------------------------------------------------------------
# small helpers
# ----------------------------------------------------------------------------
def _rup(v, m):
    return (v + m - 1) // m * m


def _pick_tile(d, prefs):
    """Largest preferred tile that divides d (d is already alignment-padded)."""
    for t in prefs:
        if d >= t and d % t == 0:
            return t
    return d


# ----------------------------------------------------------------------------
# Pallas kernels
# ----------------------------------------------------------------------------
def _mm_bn_kernel(*refs, relu, residual):
    """out = maybe_relu((x @ w) * scale + shift [+ residual]).

    Tiled over grid (M, N, K); f32 accumulator lives in VMEM scratch, the
    folded-BN / residual / ReLU epilogue runs on the last K step only.
    """
    if residual:
        x_ref, w_ref, s_ref, b_ref, r_ref, o_ref, acc_ref = refs
    else:
        x_ref, w_ref, s_ref, b_ref, o_ref, acc_ref = refs
        r_ref = None

    @pl.when(pl.program_id(2) == 0)
    def _init():
        acc_ref[...] = jnp.zeros_like(acc_ref)

    acc_ref[...] += jnp.dot(x_ref[...], w_ref[...],
                            preferred_element_type=jnp.float32)

    @pl.when(pl.program_id(2) == pl.num_programs(2) - 1)
    def _finalize():
        y = acc_ref[...] * s_ref[...] + b_ref[...]
        if residual:
            y = y + r_ref[...].astype(jnp.float32)
        if relu:
            y = jnp.maximum(y, 0.0)
        o_ref[...] = y.astype(o_ref.dtype)


def _conv3x3_s1_kernel(x_ref, w_ref, s_ref, b_ref, o_ref, acc_ref, *, wrow, relu):
    """Direct stride-1 3x3 conv (no im2col): accumulate 9 shifted matmuls over
    a row-flattened zero-padded input.  Grid = (batch, cout tiles, cin tiles)."""
    k = pl.program_id(2)

    @pl.when(k == 0)
    def _init():
        acc_ref[...] = jnp.zeros_like(acc_ref)

    l_out = acc_ref.shape[0]
    acc = acc_ref[...]
    for dy in range(3):
        for dx in range(3):
            start = dy * wrow + dx                      # static shift in the flat layout
            xm = x_ref[0, start:start + l_out, :]       # (l_out, tc)
            acc = acc + jnp.dot(xm, w_ref[dy, dx],
                                preferred_element_type=jnp.float32)
    acc_ref[...] = acc

    @pl.when(k == pl.num_programs(2) - 1)
    def _finalize():
        y = acc_ref[...] * s_ref[...] + b_ref[...]
        if relu:
            y = jnp.maximum(y, 0.0)
        o_ref[0] = y.astype(o_ref.dtype)


def _maxpool3x3s2_kernel(x_ref, o_ref):
    """3x3 / stride-2 max pool, separable, writing the strided output directly.

    Input block layout: (1, 2, 2, ho+1, wo+1, C) = (batch, H-phase, W-phase,
    H-block, W-block, C), so the stride-2 phase selection is a leading-dim index.
    """
    _, ho, wo, _ = o_ref.shape

    def rows(a, di):                                    # H window: rows 2i+{0,1,2}
        return x_ref[0, a, :, di:di + ho, :, :]         # (2, ho, wo+1, C)

    rm = jnp.maximum(jnp.maximum(rows(0, 0), rows(1, 0)), rows(0, 1))

    def cols(b, dj):                                    # W window: cols 2j+{0,1,2}
        return rm[b, :, dj:dj + wo, :]                  # (ho, wo, C)

    o_ref[0] = jnp.maximum(jnp.maximum(cols(0, 0), cols(1, 0)), cols(0, 1))


def _nonlocal_kernel(x_ref, pw_ref, pb_ref, ew_ref, eb_ref, o_ref, *, hw):
    """Non_local block (inter_channels == 1), one batch element per grid step.

    Uses (theta @ phi^T / N) @ g == theta * (sum(phi * g) / N): the (HW, HW)
    matrix is never materialized.  g/theta/phi are packed into one lane-dense
    (C, 128) projection.  The W-conv + its BatchNorm are folded into eff_w/eff_b
    (zeros for the reference init, but computed for faithfulness).
    """
    x = x_ref[0].astype(jnp.float32)                                        # (HWp, C)
    proj = jnp.dot(x, pw_ref[...], preferred_element_type=jnp.float32) + pb_ref[...]
    g, th, ph = proj[:, 0:1], proj[:, 1:2], proj[:, 2:3]                    # (HWp, 1)
    row = jax.lax.broadcasted_iota(jnp.int32, g.shape, 0)
    gm = jnp.where(row < hw, g, 0.0)                    # mask padded rows out of the sum
    s = jnp.sum(ph * gm) * (1.0 / hw)                   # scalar: (phi^T @ g) / N
    y = th * s                                          # (HWp, 1)
    wy = y * ew_ref[...] + eb_ref[...]                  # W conv + BN (folded)
    o_ref[0] = (wy + x).astype(o_ref.dtype)             # z = W_y + x


# ----------------------------------------------------------------------------
# Pallas wrappers
# ----------------------------------------------------------------------------
def matmul_affine(x, w, scale, shift, *, relu, residual=None):
    """maybe_relu((x @ w) * scale + shift [+ residual]) with (M, N, K) tiling.

    w / scale / shift are pre-padded to lane multiples at init; only the
    activation may need a (cheap) pad here (ragged M, or the 7x7 stem K).
    """
    m, k = x.shape
    kp, np_ = w.shape
    mp = _rup(m, 8)
    tm = _pick_tile(mp, (256, 128, 64, 32, 16, 8))
    tk = _pick_tile(kp, (512, 256, 128))
    tn = _pick_tile(np_, (512, 256, 128))

    xp = x if (mp == m and kp == k) else jnp.pad(x, ((0, mp - m), (0, kp - k)))
    args = [xp, w, scale, shift]
    in_specs = [
        pl.BlockSpec((tm, tk), lambda i, j, kk: (i, kk)),
        pl.BlockSpec((tk, tn), lambda i, j, kk: (kk, j)),
        pl.BlockSpec((1, tn), lambda i, j, kk: (0, j)),
        pl.BlockSpec((1, tn), lambda i, j, kk: (0, j)),
    ]
    if residual is not None:
        rp = residual if mp == m else jnp.pad(residual, ((0, mp - m), (0, 0)))
        args.append(rp.astype(jnp.bfloat16))
        in_specs.append(pl.BlockSpec((tm, tn), lambda i, j, kk: (i, j)))

    out = pl.pallas_call(
        functools.partial(_mm_bn_kernel, relu=relu,
                          residual=residual is not None),
        grid=(mp // tm, np_ // tn, kp // tk),
        in_specs=in_specs,
        out_specs=pl.BlockSpec((tm, tn), lambda i, j, kk: (i, j)),
        out_shape=jax.ShapeDtypeStruct((mp, np_), jnp.bfloat16),
        scratch_shapes=[pltpu.VMEM((tm, tn), jnp.float32)],
        compiler_params=pltpu.CompilerParams(
            dimension_semantics=("parallel", "parallel", "arbitrary"),
            vmem_limit_bytes=_VMEM_LIMIT),
    )(*args)
    return out if mp == m else out[:m]


def conv1x1_bn(x, p, stride=1, relu=True, residual=None):
    """1x1 conv + folded BN (+ fused residual add) + optional ReLU."""
    if stride > 1:
        # TODO(synk): fold the stride-2 subsample into the matmul BlockSpec.
        x = x[:, ::stride, ::stride, :]
    n, h, w, c = x.shape
    r = None
    if residual is not None:
        r = residual.reshape(n * h * w, residual.shape[-1])
    out = matmul_affine(x.reshape(n * h * w, c), p['w'], p['scale'], p['shift'],
                        relu=relu, residual=r)
    return out.reshape(n, h, w, -1)


def conv3x3_s1_bn(x, p, relu=True):
    """Stride-1 3x3 conv + folded BN + ReLU, computed in-kernel (no im2col).

    The padded input is row-flattened; each tap (dy, dx) is a contiguous
    shifted slice.  Two junk output columns per image row are dropped after."""
    n, h, w, c = x.shape
    cout_p = p['w'].shape[-1]
    wrow = w + 2                          # padded row width
    l_in = (h + 3) * wrow                 # +1 top pad, +2 bottom pad (tap spill-over)
    l_out = h * wrow
    xpad = jnp.pad(x, ((0, 0), (1, 2), (1, 1), (0, 0))).reshape(n, l_in, c)

    tc = _pick_tile(c, (256, 128))
    tn = _pick_tile(cout_p, (256, 128))
    out = pl.pallas_call(
        functools.partial(_conv3x3_s1_kernel, wrow=wrow, relu=relu),
        grid=(n, cout_p // tn, c // tc),
        in_specs=[
            pl.BlockSpec((1, l_in, tc), lambda b, j, k: (b, 0, k)),
            pl.BlockSpec((3, 3, tc, tn), lambda b, j, k: (0, 0, k, j)),
            pl.BlockSpec((1, tn), lambda b, j, k: (0, j)),
            pl.BlockSpec((1, tn), lambda b, j, k: (0, j)),
        ],
        out_specs=pl.BlockSpec((1, l_out, tn), lambda b, j, k: (b, 0, j)),
        out_shape=jax.ShapeDtypeStruct((n, l_out, cout_p), jnp.bfloat16),
        scratch_shapes=[pltpu.VMEM((l_out, tn), jnp.float32)],
        compiler_params=pltpu.CompilerParams(
            dimension_semantics=("parallel", "parallel", "arbitrary"),
            vmem_limit_bytes=_VMEM_LIMIT),
    )(xpad, p['w'], p['scale'], p['shift'])
    return out.reshape(n, h, wrow, cout_p)[:, :, :w, :]


def _im2col(x, kh, kw, stride, pad):
    # Only used for the 7x7/s2 stem and the two stride-2 3x3 convs.
    # TODO(synk): move stride-2 3x3 / 7x7 taps in-kernel as well.
    n, h, w, c = x.shape
    xp = jnp.pad(x, ((0, 0), (pad, pad), (pad, pad), (0, 0)))
    ho = (h + 2 * pad - kh) // stride + 1
    wo = (w + 2 * pad - kw) // stride + 1
    cols = []
    for dy in range(kh):
        for dx in range(kw):
            cols.append(xp[:, dy:dy + stride * (ho - 1) + 1:stride,
                           dx:dx + stride * (wo - 1) + 1:stride, :])
    patches = jnp.stack(cols, axis=3)                        # (N,Ho,Wo,kh*kw,C)
    return patches.reshape(n * ho * wo, kh * kw * c), (n, ho, wo)


def conv_im2col_bn(x, p, stride, relu=True):
    kh, kw = p['kh'], p['kw']
    flat, (n, ho, wo) = _im2col(x, kh, kw, stride, (kh - 1) // 2)
    out = matmul_affine(flat, p['w'], p['scale'], p['shift'], relu=relu)
    return out.reshape(n, ho, wo, -1)


def maxpool_3x3_s2(x):
    """3x3 / stride 2 / pad 1 max pool, strided output written directly."""
    n, h, w, c = x.shape
    ho = (h - 1) // 2 + 1
    wo = (w - 1) // 2 + 1
    hp, wp = 2 * (ho + 1), 2 * (wo + 1)
    neg = float(jnp.finfo(jnp.bfloat16).min)
    xp = jnp.pad(x, ((0, 0), (1, hp - h - 1), (1, wp - w - 1), (0, 0)),
                 constant_values=neg)
    # (N, 2, 2, ho+1, wo+1, C): stride-2 phases become leading dims.
    xr = xp.reshape(n, ho + 1, 2, wo + 1, 2, c).transpose(0, 2, 4, 1, 3, 5)
    return pl.pallas_call(
        _maxpool3x3s2_kernel,
        grid=(n,),
        in_specs=[pl.BlockSpec((1, 2, 2, ho + 1, wo + 1, c),
                               lambda b: (b, 0, 0, 0, 0, 0))],
        out_specs=pl.BlockSpec((1, ho, wo, c), lambda b: (b, 0, 0, 0)),
        out_shape=jax.ShapeDtypeStruct((n, ho, wo, c), x.dtype),
        compiler_params=pltpu.CompilerParams(
            dimension_semantics=("parallel",), vmem_limit_bytes=_VMEM_LIMIT),
    )(xr)


def nonlocal_apply(x, p):
    n, h, w, c = x.shape
    hw = h * w
    hwp = _rup(hw, 8)
    xf = x.reshape(n, hw, c)
    if hwp != hw:
        xf = jnp.pad(xf, ((0, 0), (0, hwp - hw), (0, 0)))
    out = pl.pallas_call(
        functools.partial(_nonlocal_kernel, hw=hw),
        grid=(n,),
        in_specs=[
            pl.BlockSpec((1, hwp, c), lambda b: (b, 0, 0)),   # x
            pl.BlockSpec((c, 128), lambda b: (0, 0)),          # packed g/theta/phi W
            pl.BlockSpec((1, 128), lambda b: (0, 0)),          # packed biases
            pl.BlockSpec((1, c), lambda b: (0, 0)),            # folded W-conv+BN weight
            pl.BlockSpec((1, c), lambda b: (0, 0)),            # folded W-conv+BN bias
        ],
        out_specs=pl.BlockSpec((1, hwp, c), lambda b: (b, 0, 0)),
        out_shape=jax.ShapeDtypeStruct((n, hwp, c), jnp.bfloat16),
        compiler_params=pltpu.CompilerParams(
            dimension_semantics=("parallel",), vmem_limit_bytes=_VMEM_LIMIT),
    )(xf, p['pw'], p['pb'], p['eff_w'], p['eff_b'])
    if hwp != hw:
        out = out[:, :hw, :]
    return out.reshape(n, h, w, c)


# ----------------------------------------------------------------------------
# bottleneck application
# ----------------------------------------------------------------------------
def bottleneck_apply(x, p):
    s = p['stride']
    out = conv1x1_bn(x, p['c1'], relu=True)
    if p['c2']['layout'] == 'direct':                 # stride-1 3x3, no im2col
        out = conv3x3_s1_bn(out, p['c2'], relu=True)
    else:                                             # stride-2 3x3 (2 convs total)
        out = conv_im2col_bn(out, p['c2'], stride=s, relu=True)
    idn = conv1x1_bn(x, p['down'], stride=s, relu=False) if 'down' in p else x
    # conv3 + BN + residual add + ReLU fused into a single kernel epilogue
    return conv1x1_bn(out, p['c3'], relu=True, residual=idn)


# ----------------------------------------------------------------------------
# deterministic parameter construction (BN folded, channels padded to 128)
# ----------------------------------------------------------------------------
def conv_bn_init(key, kh, kw, cin, cout, *, cin_pad=None, layout='matmul'):
    cin_pad = cin if cin_pad is None else cin_pad
    cout_p = _rup(cout, 128)
    k1, k2, k3, k4, k5 = jax.random.split(key, 5)
    fan_in = kh * kw * cin
    w = jax.random.normal(k1, (kh, kw, cin, cout), jnp.float32) / math.sqrt(fan_in)
    gamma = jax.random.uniform(k2, (cout,), jnp.float32, 0.2, 0.8)
    beta = jax.random.normal(k3, (cout,), jnp.float32) * 0.05
    mean = jax.random.normal(k4, (cout,), jnp.float32) * 0.05
    var = jax.random.uniform(k5, (cout,), jnp.float32, 0.8, 1.2)
    scale = gamma / jnp.sqrt(var + 1e-5)
    shift = beta - mean * scale
    # zero-pad input channels to the (lane-padded) feature map width and cout to 128
    w = jnp.pad(w, ((0, 0), (0, 0), (0, cin_pad - cin), (0, cout_p - cout)))
    scale = jnp.pad(scale, (0, cout_p - cout)).reshape(1, cout_p)
    shift = jnp.pad(shift, (0, cout_p - cout)).reshape(1, cout_p)
    if layout == 'direct':                       # in-kernel 3x3: keep (3,3,Cin_p,Cout_p)
        w_store = w.astype(jnp.bfloat16)
    else:                                        # matmul path: (K_pad, Cout_p), tap-major
        k_true = kh * kw * cin_pad
        k_pad = _rup(k_true, 128)
        w_store = jnp.pad(w.reshape(k_true, cout_p),
                          ((0, k_pad - k_true), (0, 0))).astype(jnp.bfloat16)
    return {'w': w_store, 'scale': scale, 'shift': shift,
            'kh': kh, 'kw': kw, 'layout': layout}


def bottleneck_init(key, cin, planes, stride, downsample):
    ks = jax.random.split(key, 4)
    cin_p = _rup(cin, 128)
    planes_p = _rup(planes, 128)
    p = {'stride': stride,
         'c1': conv_bn_init(ks[0], 1, 1, cin, planes, cin_pad=cin_p),
         'c2': conv_bn_init(ks[1], 3, 3, planes, planes, cin_pad=planes_p,
                            layout='direct' if stride == 1 else 'matmul'),
         'c3': conv_bn_init(ks[2], 1, 1, planes, planes * 4, cin_pad=planes_p)}
    if downsample:
        p['down'] = conv_bn_init(ks[3], 1, 1, cin, planes * 4, cin_pad=cin_p)
    return p


def nonlocal_init(key, c):
    ks = jax.random.split(key, 8)
    std = 1.0 / math.sqrt(c)
    g_w = jax.random.normal(ks[0], (c,), jnp.float32) * std
    g_b = jax.random.normal(ks[1], (), jnp.float32) * std
    t_w = jax.random.normal(ks[2], (c,), jnp.float32) * std
    t_b = jax.random.normal(ks[3], (), jnp.float32) * std
    ph_w = jax.random.normal(ks[4], (c,), jnp.float32) * std
    ph_b = jax.random.normal(ks[5], (), jnp.float32) * std
    # pack g/theta/phi (C,1) projections into one lane-dense (C,128) weight
    pw = jnp.zeros((c, 128), jnp.float32)
    pw = pw.at[:, 0].set(g_w).at[:, 1].set(t_w).at[:, 2].set(ph_w)
    pb = jnp.zeros((1, 128), jnp.float32)
    pb = pb.at[0, 0].set(g_b).at[0, 1].set(t_b).at[0, 2].set(ph_b)
    # W = Conv2d(1->C) followed by BatchNorm2d initialised to weight=0, bias=0;
    # fold conv + BN into eff_w/eff_b (exactly zero for this init).
    W_w = jax.random.normal(ks[6], (c,), jnp.float32)
    W_b = jax.random.normal(ks[7], (c,), jnp.float32) * 0.1
    bn_scale = jnp.zeros((c,), jnp.float32) / jnp.sqrt(jnp.ones((c,)) + 1e-5)
    eff_w = (W_w * bn_scale).reshape(1, c)
    eff_b = (W_b * bn_scale + jnp.zeros((c,), jnp.float32)).reshape(1, c)
    return {'pw': pw, 'pb': pb, 'eff_w': eff_w, 'eff_b': eff_b}


def make_params(key):
    keys = jax.random.split(key, 7)

    def make_layer(k, inplanes, planes, blocks, stride):
        ks = jax.random.split(k, blocks)
        layer = []
        for i in range(blocks):
            s = stride if i == 0 else 1
            downsample = (s != 1) or (inplanes != planes * 4)
            layer.append(bottleneck_init(ks[i], inplanes, planes, s, downsample))
            inplanes = planes * 4
        return layer, inplanes

    params = {'stem': conv_bn_init(keys[0], 7, 7, 3, 64)}
    inplanes = 64
    params['layer1'], inplanes = make_layer(keys[1], inplanes, 64, 3, 1)
    params['layer2'], inplanes = make_layer(keys[2], inplanes, 128, 4, 2)
    params['layer3'], inplanes = make_layer(keys[3], inplanes, 256, 6, 2)
    # last_conv_stride=1, last_conv_dilation=1 -> layer4 keeps spatial size
    params['layer4'], inplanes = make_layer(keys[4], inplanes, 512, 3, 1)
    params['NL_2'] = [nonlocal_init(k, 512) for k in jax.random.split(keys[5], 2)]
    params['NL_3'] = [nonlocal_init(k, 1024) for k in jax.random.split(keys[6], 3)]
    return params


# ----------------------------------------------------------------------------
# thermal_module forward
# ----------------------------------------------------------------------------
def thermal_forward(params, x_nchw):
    # external NCHW f32 -> internal NHWC bf16
    x = jnp.transpose(x_nchw, (0, 2, 3, 1)).astype(jnp.bfloat16)

    # stem: conv7x7/s2 + BN + ReLU, then maxpool3x3/s2
    x = conv_im2col_bn(x, params['stem'], stride=2, relu=True)
    x = maxpool_3x3_s2(x)

    # layer1 (NL_1_idx is empty in the reference -> no non-local here)
    for blk in params['layer1']:
        x = bottleneck_apply(x, blk)
    x_t = x  # x.clone()

    # layer2 with Non_local(512) after blocks 2 and 3
    nl2_idx, nl2 = [2, 3], 0
    for i, blk in enumerate(params['layer2']):
        x = bottleneck_apply(x, blk)
        if nl2 < len(nl2_idx) and i == nl2_idx[nl2]:
            x = nonlocal_apply(x, params['NL_2'][nl2])
            nl2 += 1

    # layer3 with Non_local(1024) after blocks 3, 4, 5
    nl3_idx, nl3 = [3, 4, 5], 0
    for i, blk in enumerate(params['layer3']):
        x = bottleneck_apply(x, blk)
        if nl3 < len(nl3_idx) and i == nl3_idx[nl3]:
            x = nonlocal_apply(x, params['NL_3'][nl3])
            nl3 += 1

    # layer4 (NL_4_idx empty)
    for blk in params['layer4']:
        x = bottleneck_apply(x, blk)

    # back to NCHW / f32 like the PyTorch module
    return (jnp.transpose(x_t, (0, 3, 1, 2)).astype(jnp.float32),
            jnp.transpose(x, (0, 3, 1, 2)).astype(jnp.float32))


# ----------------------------------------------------------------------------
# main
# ----------------------------------------------------------------------------
if __name__ == "__main__":
    key = jax.random.PRNGKey(0)
    pkey, xkey = jax.random.split(key)
    params = make_params(pkey)

    # small input consistent with the module's image-backbone forward
    x = jax.random.normal(xkey, (2, 3, 64, 64), jnp.float32)

    x_t, x_out = thermal_forward(params, x)
    jax.block_until_ready((x_t, x_out))

    assert x_t.shape == (2, 256, 16, 16), x_t.shape
    assert x_out.shape == (2, 2048, 4, 4), x_out.shape
    assert bool(jnp.all(jnp.isfinite(x_t))) and bool(jnp.all(jnp.isfinite(x_out)))
    print("KERNEL_OK")
</pallas_src>

<mosaic_0001>
module attributes {stable_mosaic.version = 11 : i64} {
  func.func @_mm_bn_kernel(%arg0: i32, %arg1: i32, %arg2: i32, %arg3: memref<256x256xbf16, #tpu.memory_space<vmem>>, %arg4: memref<256x128xbf16, #tpu.memory_space<vmem>>, %arg5: memref<1x128xf32, #tpu.memory_space<vmem>>, %arg6: memref<1x128xf32, #tpu.memory_space<vmem>>, %arg7: memref<256x128xbf16, #tpu.memory_space<vmem>>, %arg8: memref<256x128xf32, #tpu.memory_space<vmem>>) attributes {dimension_semantics = [#tpu.dimension_semantics<parallel>, #tpu.dimension_semantics<parallel>, #tpu.dimension_semantics<arbitrary>], iteration_bounds = array<i64: 8, 1, 1>, scalar_prefetch = 0 : i64, scratch_operands = 1 : i64, tpu.core_type = #tpu.core_type<tc>, window_params = [{transform_indices = @transform_0, window_bounds = array<i64: 256, 256>}, {transform_indices = @transform_1, window_bounds = array<i64: 256, 128>}, {transform_indices = @transform_2, window_bounds = array<i64: 1, 128>}, {transform_indices = @transform_3, window_bounds = array<i64: 1, 128>}, {transform_indices = @transform_4, window_bounds = array<i64: 256, 128>}]} {
    %c0_i32 = arith.constant 0 : i32
    %0 = arith.cmpi eq, %arg2, %c0_i32 : i32
    %1 = arith.extui %0 : i1 to i32
    %c0_i32_0 = arith.constant 0 : i32
    %2 = arith.cmpi ne, %1, %c0_i32_0 : i32
    scf.if %2 {
      %cst_10 = arith.constant 0.000000e+00 : f32
      %12 = vector.broadcast %cst_10 : f32 to vector<256x128xf32>
      %c0_11 = arith.constant 0 : index
      %c0_12 = arith.constant 0 : index
      %13 = vector.load %arg8[%c0_11, %c0_12] : memref<256x128xf32, #tpu.memory_space<vmem>>, vector<256x128xf32>
      tpu.vector_store %arg8[%c0_11, %c0_12], %12 {strides = array<i32>} : memref<256x128xf32, #tpu.memory_space<vmem>>, vector<256x128xf32>,
    } else {
    }
    %c0 = arith.constant 0 : index
    %c0_1 = arith.constant 0 : index
    %3 = vector.load %arg8[%c0, %c0_1] : memref<256x128xf32, #tpu.memory_space<vmem>>, vector<256x128xf32>
    %c0_2 = arith.constant 0 : index
    %c0_3 = arith.constant 0 : index
    %4 = vector.load %arg3[%c0_2, %c0_3] : memref<256x256xbf16, #tpu.memory_space<vmem>>, vector<256x256xbf16>
    %c0_4 = arith.constant 0 : index
    %c0_5 = arith.constant 0 : index
    %5 = vector.load %arg4[%c0_4, %c0_5] : memref<256x128xbf16, #tpu.memory_space<vmem>>, vector<256x128xbf16>
    %cst = arith.constant dense<0.000000e+00> : vector<256x128xf32>
    %6 = tpu.matmul %4, %5, %cst {dimension_numbers = #tpu.dot_dimension_numbers<[1], [0], [0], [1], [0, 0, 1, 1], [], []>} : vector<256x256xbf16>, vector<256x128xbf16>, vector<256x128xf32> -> vector<256x128xf32>
    %7 = arith.addf %3, %6 : vector<256x128xf32>
    %c0_6 = arith.constant 0 : index
    %c0_7 = arith.constant 0 : index
    %8 = vector.load %arg8[%c0_6, %c0_7] : memref<256x128xf32, #tpu.memory_space<vmem>>, vector<256x128xf32>
    tpu.vector_store %arg8[%c0_6, %c0_7], %7 {strides = array<i32>} : memref<256x128xf32, #tpu.memory_space<vmem>>, vector<256x128xf32>,
    %c0_i32_8 = arith.constant 0 : i32
    %9 = arith.cmpi eq, %arg2, %c0_i32_8 : i32
    %10 = arith.extui %9 : i1 to i32
    %c0_i32_9 = arith.constant 0 : i32
    %11 = arith.cmpi ne, %10, %c0_i32_9 : i32
    scf.if %11 {
      %c0_10 = arith.constant 0 : index
      %c0_11 = arith.constant 0 : index
      %12 = vector.load %arg8[%c0_10, %c0_11] : memref<256x128xf32, #tpu.memory_space<vmem>>, vector<256x128xf32>
      %c0_12 = arith.constant 0 : index
      %c0_13 = arith.constant 0 : index
      %13 = vector.load %arg5[%c0_12, %c0_13] : memref<1x128xf32, #tpu.memory_space<vmem>>, vector<1x128xf32>
      %14 = vector.broadcast %13 : vector<1x128xf32> to vector<256x128xf32>
      %15 = arith.mulf %12, %14 : vector<256x128xf32>
      %c0_14 = arith.constant 0 : index
      %c0_15 = arith.constant 0 : index
      %16 = vector.load %arg6[%c0_14, %c0_15] : memref<1x128xf32, #tpu.memory_space<vmem>>, vector<1x128xf32>
      %17 = vector.broadcast %16 : vector<1x128xf32> to vector<256x128xf32>
      %18 = arith.addf %15, %17 : vector<256x128xf32>
      %cst_16 = arith.constant 0.000000e+00 : f32
      %19 = vector.broadcast %cst_16 : f32 to vector<256x128xf32>
      %20 = arith.maximumf %18, %19 : vector<256x128xf32>
      %21 = arith.truncf %20 : vector<256x128xf32> to vector<256x128xbf16>
      %c0_17 = arith.constant 0 : index
      %c0_18 = arith.constant 0 : index
      %22 = vector.load %arg7[%c0_17, %c0_18] : memref<256x128xbf16, #tpu.memory_space<vmem>>, vector<256x128xbf16>
      tpu.vector_store %arg7[%c0_17, %c0_18], %21 {strides = array<i32>} : memref<256x128xbf16, #tpu.memory_space<vmem>>, vector<256x128xbf16>,
    } else {
    }
    return
  }
  func.func @transform_0(%arg0: i32, %arg1: i32, %arg2: i32) -> (i32, i32) {
    %c0_i32 = arith.constant 0 : i32
    return %arg0, %arg2 : i32, i32
  }
  func.func @transform_1(%arg0: i32, %arg1: i32, %arg2: i32) -> (i32, i32) {
    %c0_i32 = arith.constant 0 : i32
    return %arg2, %arg1 : i32, i32
  }
  func.func @transform_2(%arg0: i32, %arg1: i32, %arg2: i32) -> (i32, i32) {
    %c0_i32 = arith.constant 0 : i32
    %c0_i32_0 = arith.constant 0 : i32
    return %c0_i32, %arg1 : i32, i32
  }
  func.func @transform_3(%arg0: i32, %arg1: i32, %arg2: i32) -> (i32, i32) {
    %c0_i32 = arith.constant 0 : i32
    %c0_i32_0 = arith.constant 0 : i32
    return %c0_i32, %arg1 : i32, i32
  }
  func.func @transform_4(%arg0: i32, %arg1: i32, %arg2: i32) -> (i32, i32) {
    %c0_i32 = arith.constant 0 : i32
    return %arg0, %arg1 : i32, i32
  }
}

</mosaic_0001>

<bundles_post_ra>
// kernel: tpu_custom_call.1
= control target key start
LH: loop header
LB: loop body
LE: loop exit
PB: predicated region body
PF: predicated region fallthrough
CT: control target
= control target key end

     0   :  { %s2345_s0 = inlined_call_operand.hbm [shape: bf16[2048,256], index: 0, kind: input, shape index: {}]   ;;  %s2346_s1 = inlined_call_operand.hbm [shape: bf16[256,128], index: 1, kind: input, shape index: {}]   ;;  %s2347_s2 = inlined_call_operand.vmem [shape: f32[1,128], index: 2, kind: input, shape index: {}]   ;;  %s2348_s3 = inlined_call_operand.vmem [shape: f32[1,128], index: 3, kind: input, shape index: {}]   ;;  %s2349_s4 = inlined_call_operand.hbm [shape: bf16[2048,128], index: 4, kind: output, shape index: {}]  }
   0x1   :  { %2351 = sst [smem:[#allocation12_spill]] %s2346_s1 }
   0x2   :  { %9 = vsyncpa [#allocation4], 0 }
   0x3   :  { %11 = vsyncpa [#allocation4 + $0x1], 0 }
   0x4   :  { %12 = vsyncpa [#allocation7], 0 }
   0x5   :  { %13 = vsyncpa [#allocation5], 0 }
   0x6   :  { %15 = vsyncpa [#allocation5 + $0x1], 0  ;;  %s2038_s15 = smov 0   ;;  %s2040_s16 = smov 0  }
   0x7   :  { %s2042_s17 = smov 0   ;;  %s2044_s18 = smov 0  }
   0x8   :  { %s2046_s19 = smov 0   ;;  %s2048_s20 = smov 0  }
   0x9 LB: > { %s1361_s21 = sadd.s32 4294967295, %s2002_s20   ;;  %s1362_s22 = sadd.s32 4294967294, %s2002_s20   ;;  %s2002_s20 = sphi %s2048_s20, %s21_s20   ;;  %s1998_s19 = sphi %s2046_s19, %s2368_s19   ;;  %s1994_s18 = sphi %s2044_s18, %s2367_s18   ;;  %s1990_s17 = sphi %s2042_s17, %s2366_s17   ;;  %s1986_s16 = sphi %s2040_s16, %s2365_s16   ;;  %s1982_s15 = sphi %s2038_s15, %s2364_s15  }
   0xa   : > { %p62_p0 = scmp.ne.s32.totalorder %s1986_s16, %s1982_s15  ;;  %p2072_p1 = scmp.eq.s32.totalorder %s1361_s21, 0 }
   0xb   : > { %p2076_p2 = scmp.eq.s32.totalorder %s1361_s21, 7  ;;  %p174_p3 = scmp.eq.s32.totalorder %s1362_s22, 7 }
   0xc   : > { %p2082_p4 = por %p2072_p1, %p62_p0  ;;  %p1363_p5 = scmp.ge.s32.totalorder %s2002_s20, 1 }
   0xd   : > { %p2087_p6 = por %p174_p3, %p62_p0  ;;  %p181_p7 = scmp.lt.s32.totalorder %s2002_s20, 9 }
   0xe   : > { %s2004_s28 = smov [#allocation6]   ;;  %s40_s5 = sadd.s32 1, %s1998_s19 }
   0xf   : > { %s2355_s26 = scalar_select %p2087_p6, 1, 0 }
  0x10   : > { %p2092_p8 = pnand %p1363_p5, %p181_p7  ;;  %s197_s29 = sshll.u32 %s2004_s28, 4  ;;  %s198_s29 = int_to_ptr.vmem [resolvable:$true] %s197_s29 }
  0x11   : > { %s1875_s6 = scalar_lea.vmem %s198_s29, 2048  ;;  %p1883_p3 = scmp.lt.s32.totalorder %s198_s29, %s198_s29 }
  0x12   : > { %p1729_p9 = pneg %p2092_p8  ;;  %p1876_p12 = scmp.ne.s32.totalorder %s198_s29, %s1875_s6 }
  0x13   : > { %p1884_p5 = scmp.lt.s32.totalorder %s1875_s6, %s1875_s6 }
  0x14   : > { %p2100_p10 = pnand %p1729_p9, %p2072_p1 }
  0x15   : > { %p1885_p7 = por %p1884_p5, %p1883_p3 }
  0x16   : > { %p1866_p11 = pneg %p2100_p10 }
  0x18   : > { %p1878_p13 = pnand %p1876_p12, %p1866_p11 }
  0x1a   : > { %p1879_p0 = pneg %p1878_p13 }
  0x1c   : > { %p1886_p6 = pnand %p1885_p7, %p1879_p0 }
  0x1e   : > { %1889 = shalt.err (!%p1886_p6)
}
  0x1f   : > { %s2005_s7 = smov 64   ;;  %s2006_s8 = smov 4  }
  0x20   : > { %s2358_s1 = sld [smem:[#allocation12_spill]]  ;;  %p42_p9 = scmp.ge.s32.totalorder %s40_s5, 8 }
  0x21   : > { %s49_s11 = sadd.s32 1, %s1990_s17  ;;  %p56_p6 = scmp.ne.s32.totalorder %s1990_s17, %s1986_s16 }
  0x22   : > { %p57_p11 = scmp.eq.s32.totalorder %s2002_s20, 0  ;;  %s2370_s5 = smov (%p42_p9, %s40_s5), 0 }
  0x23   : > { %p2124_p13 = por %p2076_p2, %p56_p6  ;;  %s44_s14 = ssub.s32 %s1998_s19, %s2370_s5 }
  0x24   : > { %p2118_p12 = por %p57_p11, %p56_p6  ;;  %p1742_p0 = scmp.lt.s32.totalorder %s2002_s20, 8 }
  0x25   : > { %s2360_s13 = scalar_select %p2124_p13, 1, 0 }
  0x26   : > { %1732 = dma.hbm_to_vmem [thread:$0]  (!%p2100_p10), %s2358_s1, 2048, %s198_s29, [#allocation7], %s2005_s7, %s2005_s7, %s2006_s8  }
  0x27   : > { %p47_p10 = scmp.eq.s32.totalorder %s44_s14, 0  ;;  %s223_s21 = sand.u32 1, %s1990_s17  }
  0x28   : > { %s1368_s22 = sshll.u32 %s223_s21, 8  ;;  %s1464_s29 = sshll.u32 %s1998_s19, 12 }
  0x29   : > { %s2133_s28 = scalar_select %p47_p10, %s1990_s17, %s49_s11  }
  0x2a   : > { %s236_s7 = scalar_lea.hbm %s2345_s0, %s1464_s29  ;;  %s227_s8 = scalar_lea.vmem [#allocation3], %s1368_s22 }
  0x2b   : > { %s237_s9 = sshll.u32 %s227_s8, 4  ;;  %p2141_p2 = pnand %p1742_p0, %p2118_p12  ;;  %s238_s9 = int_to_ptr.vmem [resolvable:$true] %s237_s9 }
  0x2c   : > { %s224_s10 = scalar_lea.sflag [#allocation4], %s223_s21  ;;  %s1903_s14 = scalar_lea.vmem %s238_s9, 4096 }
  0x2d   : > { %p1892_p3 = pneg %p2141_p2  ;;  %p1904_p5 = scmp.ne.s32.totalorder %s238_s9, %s1903_s14 }
  0x2e   : > { %s2007_s11 = smov [#allocation3]  }
  0x2f   : > { %p1906_p7 = pnand %p1904_p5, %p1892_p3  ;;  %s1908_s1 = sshll.u32 %s2007_s11, 4  ;;  %s1909_s1 = int_to_ptr.vmem [resolvable:$false] %s1908_s1 }
  0x30   : > { %s1910_s29 = scalar_lea.vmem %s1909_s1, 8192  ;;  %p1911_p6 = scmp.lt.s32.totalorder %s238_s9, %s1909_s1 }
  0x31   : > { %p1907_p9 = pneg %p1906_p7  ;;  %p1912_p11 = scmp.lt.s32.totalorder %s1910_s29, %s1903_s14 }
  0x33   : > { %p1913_p10 = por %p1912_p11, %p1911_p6 }
  0x35   : > { %p1914_p13 = pnand %p1913_p10, %p1907_p9 }
  0x37   : > { %1917 = shalt.err (!%p1914_p13)
}
  0x38   : > { %s2008_s12 = smov 128   ;;  %s2009_s22 = smov 8  }
  0x39   : > { %1736 = dma.hbm_to_vmem [thread:$0]  (!%p2141_p2), %s236_s7, 4096, %s238_s9, %s224_s10, %s2008_s12, %s2008_s12, %s2009_s22  }
  0x3a   : > { %249 = sbr.rel (%p2092_p8) target bundleno = 378 (0x17a), region = 36  ;;  %s2152_s21 = sand.u32 (!%p2092_p8), 1, %s1986_s16  }
  0x3b   : > { %s1373_s30 = sshll.u32 (!%p2092_p8), %s2152_s21, 8  ;;  %s252_s1 = scalar_lea.sflag (!%p2092_p8), [#allocation4], %s2152_s21 }
  0x3c   : > { %s2156_s6 = scalar_lea.vmem (!%p2092_p8), [#allocation3], %s1373_s30 }
  0x3f   : > { %1969 = dma.done.wait (%p2082_p4), %s252_s1, 4096  }
  0x40   : > { %1971 = vsyncadd (%p2082_p4), %s252_s1, 4294963200 }
  0x41   : > { %1973 = dma.done.wait (%p2072_p1), [#allocation7], 2048  }
  0x42   : > { %1975 = vsyncadd (%p2072_p1), [#allocation7], 4294965248  ;;  %v1800_v0 = vld [vmem:[#allocation6 + $0x78] sm:$0xff]   ;;  %v1802_v2 = vld [vmem:[#allocation6 + $0x70] sm:$0xff]   ;;  %s1375_s8 = sshll.u32 %s2152_s21, 7  ;;  %s1497_s24 = sshll.u32 %s1994_s18, 11 }
  0x43   : > { %v1801_v1 = vld [vmem:[#allocation6 + $0x38] sm:$0xff]   ;;  %1593 = vmatprep.subr.bf16.mxu0 %v1800_v0  ;;  %1705 = vmatprep.subr.bf16.mxu1 %v1800_v0  ;;  %v1803_v3 = vld [vmem:[#allocation6 + $0x30] sm:$0xff]   ;;  %v1804_v4 = vld [vmem:[#allocation6 + $0x68] sm:$0xff]   ;;  %s2219_s9 = scalar_lea.vmem [#allocation8], %s1375_s8  ;;  %s2294_s29 = scalar_lea.hbm %s2349_s4, %s1497_s24 }
  0x44   : > { %1594 = vmatpush3.bf16.msra.mxu0 %v1801_v1  ;;  %1713 = vmatpush3.bf16.msra.mxu1 %v1801_v1  ;;  %v1805_v5 = vld [vmem:[#allocation6 + $0x28] sm:$0xff]   ;;  %v1806_v6 = vld [vmem:[#allocation6 + $0x60] sm:$0xff]   ;;  %v1808_v8 = vld [vmem:[#allocation6 + $0x58] sm:$0xff]   ;;  %s1234_s10 = sshll.u32 %s2219_s9, 4  ;;  %s1220_s18 = scalar_lea.sflag [#allocation5], %s2152_s21  ;;  %s2296_s10 = int_to_ptr.vmem [resolvable:$true] %s1234_s10 }
  0x45   : > { %1595 = vmatprep.subr.bf16.mxu0 %v1802_v2  ;;  %1706 = vmatprep.subr.bf16.mxu1 %v1802_v2  ;;  %v1807_v7 = vld [vmem:[#allocation6 + $0x20] sm:$0xff]   ;;  %v1809_v9 = vld [vmem:[#allocation6 + $0x18] sm:$0xff]   ;;  %v1810_v10 = vld [vmem:[#allocation6 + $0x50] sm:$0xff]   ;;  %s1918_s12 = scalar_lea.vmem %s2296_s10, 2048  ;;  %p2362_p4 = scmp.ne.s32.totalorder %s2360_s13, 0 }
  0x46   : > { %v1818_v11 = vld [vmem:[%s2156_s6 + $0x4] ss:$8 sps:$4 sm:$0xff]   ;;  %v1811_v13 = vld [vmem:[#allocation6 + $0x10] sm:$0xff]   ;;  %v1816_v18 = vld [vmem:[%s2156_s6] ss:$8 sps:$4 sm:$0xff]   ;;  %p1919_p1 = scmp.ne.s32.totalorder %s2296_s10, %s1918_s12  ;;  %s2010_s22 = smov [#allocation8]  }
  0x47   : > { %v1821_v12 = vld [vmem:[%s2156_s6 + $0x84] ss:$8 sps:$4 sm:$0xff]   ;;  %721 = vmatprep.mubr.bf16.mxu0 %v1818_v11  ;;  %v1819_v19 = vld [vmem:[%s2156_s6 + $0x80] ss:$8 sps:$4 sm:$0xff]   ;;  %v1822_v20 = vld [vmem:[%s2156_s6 + $0x14] ss:$8 sps:$4 sm:$0xff]  }
  0x48   : > { %1596 = vmatpush3.bf16.msra.mxu0 %v1803_v3  ;;  %1714 = vmatpush3.bf16.msra.mxu1 %v1803_v3  ;;  %v1812_v14 = vld [vmem:[#allocation6 + $0x48] sm:$0xff]   ;;  %v1814_v16 = vld [vmem:[#allocation6 + $0x40] sm:$0xff]   ;;  %v1824_v21 = vld [vmem:[%s2156_s6 + $0x94] ss:$8 sps:$4 sm:$0xff]   ;;  %p1920_p8 = pnand %p1919_p1, %p2362_p4  ;;  %s1922_s30 = sshll.u32 %s2010_s22, 4  ;;  %s1923_s30 = int_to_ptr.vmem [resolvable:$false] %s1922_s30 }
  0x49   : > { %1597 = vmatprep.subr.bf16.mxu0 %v1804_v4  ;;  %1707 = vmatprep.subr.bf16.mxu1 %v1804_v4  ;;  %v1813_v15 = vld [vmem:[#allocation6 + $0x8] sm:$0xff]   ;;  %v1815_v17 = vld [vmem:[#allocation6] sm:$0xff]   ;;  %v1826_v22 = vld [vmem:[%s2156_s6 + $0x10] ss:$8 sps:$4 sm:$0xff]   ;;  %s1924_s1 = scalar_lea.vmem %s1923_s30, 4096  ;;  %p1925_p13 = scmp.lt.s32.totalorder %s2296_s10, %s1923_s30 }
  0x4a   : > { %785 = vmatprep.mubr.bf16.mxu1 %v1821_v12  ;;  %v1827_v23 = vld [vmem:[%s2156_s6 + $0x90] ss:$8 sps:$4 sm:$0xff]   ;;  %v1828_v24 = vld [vmem:[%s2156_s6 + $0x24] ss:$8 sps:$4 sm:$0xff]   ;;  %v1832_v26 = vld [vmem:[%s2156_s6 + $0x20] ss:$8 sps:$4 sm:$0xff]   ;;  %p1921_p12 = pneg %p1920_p8  ;;  %p1926_p0 = scmp.lt.s32.totalorder %s1924_s1, %s1918_s12 }
  0x4b   : > { %v1830_v25 = vld [vmem:[%s2156_s6 + $0xa4] ss:$8 sps:$4 sm:$0xff]   ;;  %v1833_v27 = vld [vmem:[%s2156_s6 + $0xa0] ss:$8 sps:$4 sm:$0xff]   ;;  %v1834_v28 = vld [vmem:[%s2156_s6 + $0x34] ss:$8 sps:$4 sm:$0xff]  }
  0x4c   : > { %1598 = vmatpush3.bf16.msra.mxu0 %v1805_v5  ;;  %1715 = vmatpush3.bf16.msra.mxu1 %v1805_v5  ;;  %v1836_v29 = vld [vmem:[%s2156_s6 + $0xb4] ss:$8 sps:$4 sm:$0xff]   ;;  %v1838_v30 = vld [vmem:[%s2156_s6 + $0x30] ss:$8 sps:$4 sm:$0xff]   ;;  %v1840_v32 = vld [vmem:[%s2156_s6 + $0x44] ss:$8 sps:$4 sm:$0xff]   ;;  %p1927_p2 = por %p1926_p0, %p1925_p13 }
  0x4d   : > { %1599 = vmatprep.subr.bf16.mxu0 %v1806_v6  ;;  %1708 = vmatprep.subr.bf16.mxu1 %v1806_v6  ;;  %v1839_v31 = vld [vmem:[%s2156_s6 + $0xb0] ss:$8 sps:$4 sm:$0xff]   ;;  %v1842_v33 = vld [vmem:[%s2156_s6 + $0xc4] ss:$8 sps:$4 sm:$0xff]   ;;  %v1844_v34 = vld [vmem:[%s2156_s6 + $0x40] ss:$8 sps:$4 sm:$0xff]  }
  0x4e   : > { %v1845_v35 = vld [vmem:[%s2156_s6 + $0xc0] ss:$8 sps:$4 sm:$0xff]   ;;  %v1846_v36 = vld [vmem:[%s2156_s6 + $0x54] ss:$8 sps:$4 sm:$0xff]   ;;  %v1850_v38 = vld [vmem:[%s2156_s6 + $0x50] ss:$8 sps:$4 sm:$0xff]   ;;  %p1928_p3 = pnand %p1927_p2, %p1921_p12 }
  0x4f   : > { %v1848_v37 = vld [vmem:[%s2156_s6 + $0xd4] ss:$8 sps:$4 sm:$0xff]   ;;  %v1851_v39 = vld [vmem:[%s2156_s6 + $0xd0] ss:$8 sps:$4 sm:$0xff]   ;;  %v1852_v40 = vld [vmem:[%s2156_s6 + $0x64] ss:$8 sps:$4 sm:$0xff]  }
  0x50   : > { %1600 = vmatpush3.bf16.msra.mxu0 %v1807_v7  ;;  %1716 = vmatpush3.bf16.msra.mxu1 %v1807_v7  ;;  %v1854_v41 = vld [vmem:[%s2156_s6 + $0xe4] ss:$8 sps:$4 sm:$0xff]   ;;  %v1856_v42 = vld [vmem:[%s2156_s6 + $0x60] ss:$8 sps:$4 sm:$0xff]   ;;  %v1858_v44 = vld [vmem:[%s2156_s6 + $0x74] ss:$8 sps:$4 sm:$0xff]  }
  0x51   : > { %1601 = vmatprep.subr.bf16.mxu0 %v1808_v8  ;;  %1709 = vmatprep.subr.bf16.mxu1 %v1808_v8  ;;  %v1857_v43 = vld [vmem:[%s2156_s6 + $0xe0] ss:$8 sps:$4 sm:$0xff]   ;;  %v1860_v45 = vld [vmem:[%s2156_s6 + $0xf4] ss:$8 sps:$4 sm:$0xff]   ;;  %v1862_v46 = vld [vmem:[%s2156_s6 + $0x70] ss:$8 sps:$4 sm:$0xff]  }
  0x52   : > { %v1863_v47 = vld [vmem:[%s2156_s6 + $0xf0] ss:$8 sps:$4 sm:$0xff]   ;;  %v2201_v51 = vld [vmem:[%s2347_s2] ss:$0 sm:$0xff] }
  0x53   : > { %v2208_v59 = vld [vmem:[%s2348_s3] ss:$0 sm:$0xff] }
  0x54   : > { %1602 = vmatpush3.bf16.msra.mxu0 %v1809_v9  ;;  %1717 = vmatpush3.bf16.msra.mxu1 %v1809_v9 }
  0x55   : > { %1603 = vmatprep.subr.bf16.mxu0 %v1810_v10  ;;  %1710 = vmatprep.subr.bf16.mxu1 %v1810_v10 }
  0x58   : > { %1604 = vmatpush3.bf16.msra.mxu0 %v1811_v13  ;;  %1718 = vmatpush3.bf16.msra.mxu1 %v1811_v13 }
  0x59   : > { %1605 = vmatprep.subr.bf16.mxu0 %v1812_v14  ;;  %1711 = vmatprep.subr.bf16.mxu1 %v1812_v14 }
  0x5c   : > { %1606 = vmatpush3.bf16.msra.mxu0 %v1813_v15  ;;  %1719 = vmatpush3.bf16.msra.mxu1 %v1813_v15 }
  0x5d   : > { %1607 = vmatprep.subr.bf16.mxu0 %v1814_v16  ;;  %1712 = vmatprep.subr.bf16.mxu1 %v1814_v16 }
  0x60   : > { %1608 = vmatpush3.bf16.msra.mxu0 %v1815_v17  ;;  %1720 = vmatpush3.bf16.msra.mxu1 %v1815_v17 }
  0x63   : > { %722 = vmatmul.mubr.bf16.vlgmr.msra.gmra.mxu0 %v1816_v18  ;;  %786 = vmatmul.mubr.bf16.vlgmr.msra.gmra.mxu1 %v1819_v19 }
  0x64   : > { %729 = vmatprep.mubr.bf16.mxu0 %v1822_v20  ;;  %793 = vmatprep.mubr.bf16.mxu1 %v1824_v21 }
  0x6b   : > { %730 = vmatmul.mubr.bf16.gmra.mxu0 %v1826_v22  ;;  %794 = vmatmul.mubr.bf16.gmra.mxu1 %v1827_v23 }
  0x6c   : > { %737 = vmatprep.mubr.bf16.mxu0 %v1828_v24  ;;  %801 = vmatprep.mubr.bf16.mxu1 %v1830_v25 }
  0x73   : > { %738 = vmatmul.mubr.bf16.gmra.mxu0 %v1832_v26  ;;  %802 = vmatmul.mubr.bf16.gmra.mxu1 %v1833_v27 }
  0x74   : > { %745 = vmatprep.mubr.bf16.mxu0 %v1834_v28  ;;  %809 = vmatprep.mubr.bf16.mxu1 %v1836_v29 }
  0x7b   : > { %746 = vmatmul.mubr.bf16.gmra.mxu0 %v1838_v30  ;;  %810 = vmatmul.mubr.bf16.gmra.mxu1 %v1839_v31 }
  0x7c   : > { %753 = vmatprep.mubr.bf16.mxu0 %v1840_v32  ;;  %817 = vmatprep.mubr.bf16.mxu1 %v1842_v33 }
  0x83   : > { %754 = vmatmul.mubr.bf16.gmra.mxu0 %v1844_v34  ;;  %818 = vmatmul.mubr.bf16.gmra.mxu1 %v1845_v35 }
  0x84   : > { %761 = vmatprep.mubr.bf16.mxu0 %v1846_v36  ;;  %825 = vmatprep.mubr.bf16.mxu1 %v1848_v37 }
  0x8b   : > { %762 = vmatmul.mubr.bf16.gmra.mxu0 %v1850_v38  ;;  %826 = vmatmul.mubr.bf16.gmra.mxu1 %v1851_v39 }
  0x8c   : > { %769 = vmatprep.mubr.bf16.mxu0 %v1852_v40  ;;  %833 = vmatprep.mubr.bf16.mxu1 %v1854_v41 }
  0x93   : > { %770 = vmatmul.mubr.bf16.gmra.mxu0 %v1856_v42  ;;  %834 = vmatmul.mubr.bf16.gmra.mxu1 %v1857_v43 }
  0x94   : > { %777 = vmatprep.mubr.bf16.mxu0 %v1858_v44  ;;  %841 = vmatprep.mubr.bf16.mxu1 %v1860_v45 }
  0x9b   : > { %778 = vmatmul.mubr.bf16.gmra.mxu0 %v1862_v46  ;;  %842 = vmatmul.mubr.bf16.gmra.mxu1 %v1863_v47 }
 0x123   : > { %v1609_v48 = vpop.f32.mrf.mxu0  ;;  %v1657_v49 = vpop.f32.mrf.mxu1 }
 0x125   : > { %v1610_v50 = vpop.f32.mrf.mxu0  ;;  %v1658_v52 = vpop.f32.mrf.mxu1 }
 0x126   : > { %v1611_v53 = vadd.f32 %v1610_v50, %v1609_v48  ;;  %v1659_v54 = vadd.f32 %v1658_v52, %v1657_v49 }
 0x127   : > { %v1612_v55 = vpop.f32.mrf.mxu0  ;;  %v1660_v56 = vpop.f32.mrf.mxu1 }
 0x128   : > { %v956_v57 = vmul.f32 %v1611_v53, %v2201_v51  ;;  %v972_v58 = vmul.f32 %v1659_v54, %v2201_v51 }
 0x129   : > { %v1613_v60 = vpop.f32.mrf.mxu0  ;;  %v1661_v61 = vpop.f32.mrf.mxu1 }
 0x12a   : > { %v1614_v62 = vadd.f32 %v1613_v60, %v1612_v55  ;;  %v1662_v63 = vadd.f32 %v1661_v61, %v1660_v56  ;;  %v995_v2 = vadd.f32 %v2208_v59, %v956_v57  ;;  %v1011_v3 = vadd.f32 %v2208_v59, %v972_v58 }
 0x12b   : > { %v1615_v0 = vpop.f32.mrf.mxu0  ;;  %v1663_v1 = vpop.f32.mrf.mxu1 }
 0x12c   : > { %v957_v4 = vmul.f32 %v1614_v62, %v2201_v51  ;;  %v973_v5 = vmul.f32 %v1662_v63, %v2201_v51  ;;  %v1027_v14 = vmax.f32 %v995_v2, 0.0  ;;  %v1043_v15 = vmax.f32 %v1011_v3, 0.0 }
 0x12d   : > { %v1616_v6 = vpop.f32.mrf.mxu0  ;;  %v1664_v7 = vpop.f32.mrf.mxu1 }
 0x12e   : > { %v996_v8 = vadd.f32 %v2208_v59, %v957_v4  ;;  %v1012_v9 = vadd.f32 %v2208_v59, %v973_v5  ;;  %v1617_v10 = vadd.f32 %v1616_v6, %v1615_v0  ;;  %v1665_v11 = vadd.f32 %v1664_v7, %v1663_v1 }
 0x12f   : > { %v1618_v12 = vpop.f32.mrf.mxu0  ;;  %v1666_v13 = vpop.f32.mrf.mxu1 }
 0x130   : > { %v1028_v16 = vmax.f32 %v996_v8, 0.0  ;;  %v1044_v17 = vmax.f32 %v1012_v9, 0.0  ;;  %v958_v18 = vmul.f32 %v1617_v10, %v2201_v51  ;;  %v974_v19 = vmul.f32 %v1665_v11, %v2201_v51 }
 0x131   : > { %v1619_v20 = vpop.f32.mrf.mxu0  ;;  %v1667_v21 = vpop.f32.mrf.mxu1 }
 0x132   : > { %v1501_v22 = vpack.c.bf16 %v1028_v16, %v1027_v14  ;;  %v1541_v23 = vpack.c.bf16 %v1044_v17, %v1043_v15  ;;  %v1620_v24 = vadd.f32 %v1619_v20, %v1618_v12  ;;  %v1668_v25 = vadd.f32 %v1667_v21, %v1666_v13 }
 0x133   : > { %v1621_v26 = vpop.f32.mrf.mxu0  ;;  %v1669_v27 = vpop.f32.mrf.mxu1  ;;  %v997_v28 = vadd.f32 %v2208_v59, %v958_v18  ;;  %v1013_v29 = vadd.f32 %v2208_v59, %v974_v19 }
 0x134   : > { %1502 = vst [vmem:[%s2219_s9] sm:$0xff] %v1501_v22   ;;  %1585 = vst [vmem:[%s2219_s9 + $0x40] sm:$0xff] %v1541_v23   ;;  %v959_v30 = vmul.f32 %v1620_v24, %v2201_v51  ;;  %v975_v31 = vmul.f32 %v1668_v25, %v2201_v51 }
 0x135   : > { %v1622_v32 = vpop.f32.mrf.mxu0  ;;  %v1670_v33 = vpop.f32.mrf.mxu1  ;;  %v1029_v42 = vmax.f32 %v997_v28, 0.0  ;;  %v1045_v43 = vmax.f32 %v1013_v29, 0.0 }
 0x136   : > { %v1623_v34 = vadd.f32 %v1622_v32, %v1621_v26  ;;  %v1671_v35 = vadd.f32 %v1670_v33, %v1669_v27  ;;  %v998_v36 = vadd.f32 %v2208_v59, %v959_v30  ;;  %v1014_v37 = vadd.f32 %v2208_v59, %v975_v31 }
 0x137   : > { %v1624_v38 = vpop.f32.mrf.mxu0  ;;  %v1672_v39 = vpop.f32.mrf.mxu1 }
 0x138   : > { %v960_v40 = vmul.f32 %v1623_v34, %v2201_v51  ;;  %v976_v41 = vmul.f32 %v1671_v35, %v2201_v51  ;;  %v1030_v44 = vmax.f32 %v998_v36, 0.0  ;;  %v1046_v45 = vmax.f32 %v1014_v37, 0.0 }
 0x139   : > { %v1625_v46 = vpop.f32.mrf.mxu0  ;;  %v1673_v47 = vpop.f32.mrf.mxu1 }
 0x13a   : > { %v1626_v48 = vadd.f32 %v1625_v46, %v1624_v38  ;;  %v1674_v49 = vadd.f32 %v1673_v47, %v1672_v39  ;;  %v1506_v50 = vpack.c.bf16 %v1030_v44, %v1029_v42  ;;  %v1546_v52 = vpack.c.bf16 %v1046_v45, %v1045_v43 }
 0x13b   : > { %v1627_v53 = vpop.f32.mrf.mxu0  ;;  %v1675_v54 = vpop.f32.mrf.mxu1  ;;  %v999_v55 = vadd.f32 %v2208_v59, %v960_v40  ;;  %v1015_v56 = vadd.f32 %v2208_v59, %v976_v41 }
 0x13c   : > { %v961_v57 = vmul.f32 %v1626_v48, %v2201_v51  ;;  %v977_v58 = vmul.f32 %v1674_v49, %v2201_v51  ;;  %1578 = vst [vmem:[%s2219_s9 + $0x8] sm:$0xff] %v1506_v50   ;;  %1586 = vst [vmem:[%s2219_s9 + $0x48] sm:$0xff] %v1546_v52  }
 0x13d   : > { %v1628_v60 = vpop.f32.mrf.mxu0  ;;  %v1676_v61 = vpop.f32.mrf.mxu1  ;;  %v1031_v4 = vmax.f32 %v999_v55, 0.0  ;;  %v1047_v5 = vmax.f32 %v1015_v56, 0.0 }
 0x13e   : > { %v1000_v62 = vadd.f32 %v2208_v59, %v961_v57  ;;  %v1016_v63 = vadd.f32 %v2208_v59, %v977_v58  ;;  %v1629_v0 = vadd.f32 %v1628_v60, %v1627_v53  ;;  %v1677_v1 = vadd.f32 %v1676_v61, %v1675_v54 }
 0x13f   : > { %v1630_v2 = vpop.f32.mrf.mxu0  ;;  %v1678_v3 = vpop.f32.mrf.mxu1 }
 0x140   : > { %v1032_v6 = vmax.f32 %v1000_v62, 0.0  ;;  %v1048_v7 = vmax.f32 %v1016_v63, 0.0  ;;  %v962_v8 = vmul.f32 %v1629_v0, %v2201_v51  ;;  %v978_v9 = vmul.f32 %v1677_v1, %v2201_v51 }
 0x141   : > { %v1631_v10 = vpop.f32.mrf.mxu0  ;;  %v1679_v11 = vpop.f32.mrf.mxu1 }
 0x142   : > { %v1511_v12 = vpack.c.bf16 %v1032_v6, %v1031_v4  ;;  %v1551_v13 = vpack.c.bf16 %v1048_v7, %v1047_v5  ;;  %v1632_v14 = vadd.f32 %v1631_v10, %v1630_v2  ;;  %v1680_v15 = vadd.f32 %v1679_v11, %v1678_v3 }
 0x143   : > { %v1633_v16 = vpop.f32.mrf.mxu0  ;;  %v1681_v17 = vpop.f32.mrf.mxu1  ;;  %v1001_v18 = vadd.f32 %v2208_v59, %v962_v8  ;;  %v1017_v19 = vadd.f32 %v2208_v59, %v978_v9 }
 0x144   : > { %1579 = vst [vmem:[%s2219_s9 + $0x10] sm:$0xff] %v1511_v12   ;;  %1587 = vst [vmem:[%s2219_s9 + $0x50] sm:$0xff] %v1551_v13   ;;  %v963_v20 = vmul.f32 %v1632_v14, %v2201_v51  ;;  %v979_v21 = vmul.f32 %v1680_v15, %v2201_v51 }
 0x145   : > { %v1634_v22 = vpop.f32.mrf.mxu0  ;;  %v1682_v23 = vpop.f32.mrf.mxu1  ;;  %v1033_v32 = vmax.f32 %v1001_v18, 0.0  ;;  %v1049_v33 = vmax.f32 %v1017_v19, 0.0 }
 0x146   : > { %v1635_v24 = vadd.f32 %v1634_v22, %v1633_v16  ;;  %v1683_v25 = vadd.f32 %v1682_v23, %v1681_v17  ;;  %v1002_v26 = vadd.f32 %v2208_v59, %v963_v20  ;;  %v1018_v27 = vadd.f32 %v2208_v59, %v979_v21 }
 0x147   : > { %v1636_v28 = vpop.f32.mrf.mxu0  ;;  %v1684_v29 = vpop.f32.mrf.mxu1 }
 0x148   : > { %v964_v30 = vmul.f32 %v1635_v24, %v2201_v51  ;;  %v980_v31 = vmul.f32 %v1683_v25, %v2201_v51  ;;  %v1034_v34 = vmax.f32 %v1002_v26, 0.0  ;;  %v1050_v35 = vmax.f32 %v1018_v27, 0.0 }
 0x149   : > { %v1637_v36 = vpop.f32.mrf.mxu0  ;;  %v1685_v37 = vpop.f32.mrf.mxu1 }
 0x14a   : > { %v1638_v38 = vadd.f32 %v1637_v36, %v1636_v28  ;;  %v1686_v39 = vadd.f32 %v1685_v37, %v1684_v29  ;;  %v1516_v40 = vpack.c.bf16 %v1034_v34, %v1033_v32  ;;  %v1556_v41 = vpack.c.bf16 %v1050_v35, %v1049_v33 }
 0x14b   : > { %v1639_v42 = vpop.f32.mrf.mxu0  ;;  %v1687_v43 = vpop.f32.mrf.mxu1  ;;  %v1003_v44 = vadd.f32 %v2208_v59, %v964_v30  ;;  %v1019_v45 = vadd.f32 %v2208_v59, %v980_v31 }
 0x14c   : > { %v965_v46 = vmul.f32 %v1638_v38, %v2201_v51  ;;  %v981_v47 = vmul.f32 %v1686_v39, %v2201_v51  ;;  %1580 = vst [vmem:[%s2219_s9 + $0x18] sm:$0xff] %v1516_v40   ;;  %1588 = vst [vmem:[%s2219_s9 + $0x58] sm:$0xff] %v1556_v41  }
 0x14d   : > { %v1640_v48 = vpop.f32.mrf.mxu0  ;;  %v1688_v49 = vpop.f32.mrf.mxu1  ;;  %v1035_v57 = vmax.f32 %v1003_v44, 0.0  ;;  %v1051_v58 = vmax.f32 %v1019_v45, 0.0 }
 0x14e   : > { %v1004_v50 = vadd.f32 %v2208_v59, %v965_v46  ;;  %v1020_v52 = vadd.f32 %v2208_v59, %v981_v47  ;;  %v1641_v53 = vadd.f32 %v1640_v48, %v1639_v42  ;;  %v1689_v54 = vadd.f32 %v1688_v49, %v1687_v43 }
 0x14f   : > { %v1642_v55 = vpop.f32.mrf.mxu0  ;;  %v1690_v56 = vpop.f32.mrf.mxu1 }
 0x150   : > { %v1036_v60 = vmax.f32 %v1004_v50, 0.0  ;;  %v1052_v61 = vmax.f32 %v1020_v52, 0.0  ;;  %v966_v62 = vmul.f32 %v1641_v53, %v2201_v51  ;;  %v982_v63 = vmul.f32 %v1689_v54, %v2201_v51 }
 0x151   : > { %v1643_v0 = vpop.f32.mrf.mxu0  ;;  %v1691_v1 = vpop.f32.mrf.mxu1 }
 0x152   : > { %v1521_v2 = vpack.c.bf16 %v1036_v60, %v1035_v57  ;;  %v1561_v3 = vpack.c.bf16 %v1052_v61, %v1051_v58  ;;  %v1644_v4 = vadd.f32 %v1643_v0, %v1642_v55  ;;  %v1692_v5 = vadd.f32 %v1691_v1, %v1690_v56 }
 0x153   : > { %v1645_v6 = vpop.f32.mrf.mxu0  ;;  %v1693_v7 = vpop.f32.mrf.mxu1  ;;  %v1005_v8 = vadd.f32 %v2208_v59, %v966_v62  ;;  %v1021_v9 = vadd.f32 %v2208_v59, %v982_v63 }
 0x154   : > { %1581 = vst [vmem:[%s2219_s9 + $0x20] sm:$0xff] %v1521_v2   ;;  %1589 = vst [vmem:[%s2219_s9 + $0x60] sm:$0xff] %v1561_v3   ;;  %v967_v10 = vmul.f32 %v1644_v4, %v2201_v51  ;;  %v983_v11 = vmul.f32 %v1692_v5, %v2201_v51 }
 0x155   : > { %v1646_v12 = vpop.f32.mrf.mxu0  ;;  %v1694_v13 = vpop.f32.mrf.mxu1  ;;  %v1037_v22 = vmax.f32 %v1005_v8, 0.0  ;;  %v1053_v23 = vmax.f32 %v1021_v9, 0.0 }
 0x156   : > { %v1647_v14 = vadd.f32 %v1646_v12, %v1645_v6  ;;  %v1695_v15 = vadd.f32 %v1694_v13, %v1693_v7  ;;  %v1006_v16 = vadd.f32 %v2208_v59, %v967_v10  ;;  %v1022_v17 = vadd.f32 %v2208_v59, %v983_v11 }
 0x157   : > { %v1648_v18 = vpop.f32.mrf.mxu0  ;;  %v1696_v19 = vpop.f32.mrf.mxu1 }
 0x158   : > { %v968_v20 = vmul.f32 %v1647_v14, %v2201_v51  ;;  %v984_v21 = vmul.f32 %v1695_v15, %v2201_v51  ;;  %v1038_v24 = vmax.f32 %v1006_v16, 0.0  ;;  %v1054_v25 = vmax.f32 %v1022_v17, 0.0 }
 0x159   : > { %v1649_v26 = vpop.f32.mrf.mxu0  ;;  %v1697_v27 = vpop.f32.mrf.mxu1 }
 0x15a   : > { %v1650_v28 = vadd.f32 %v1649_v26, %v1648_v18  ;;  %v1698_v29 = vadd.f32 %v1697_v27, %v1696_v19  ;;  %v1526_v30 = vpack.c.bf16 %v1038_v24, %v1037_v22  ;;  %v1566_v31 = vpack.c.bf16 %v1054_v25, %v1053_v23 }
 0x15b   : > { %v1651_v32 = vpop.f32.mrf.mxu0  ;;  %v1699_v33 = vpop.f32.mrf.mxu1  ;;  %v1007_v34 = vadd.f32 %v2208_v59, %v968_v20  ;;  %v1023_v35 = vadd.f32 %v2208_v59, %v984_v21 }
 0x15c   : > { %v969_v36 = vmul.f32 %v1650_v28, %v2201_v51  ;;  %v985_v37 = vmul.f32 %v1698_v29, %v2201_v51  ;;  %1582 = vst [vmem:[%s2219_s9 + $0x28] sm:$0xff] %v1526_v30   ;;  %1590 = vst [vmem:[%s2219_s9 + $0x68] sm:$0xff] %v1566_v31  }
 0x15d   : > { %v1652_v38 = vpop.f32.mrf.mxu0  ;;  %v1700_v39 = vpop.f32.mrf.mxu1  ;;  %v1039_v46 = vmax.f32 %v1007_v34, 0.0  ;;  %v1055_v47 = vmax.f32 %v1023_v35, 0.0 }
 0x15e   : > { %v1008_v40 = vadd.f32 %v2208_v59, %v969_v36  ;;  %v1024_v41 = vadd.f32 %v2208_v59, %v985_v37  ;;  %v1653_v42 = vadd.f32 %v1652_v38, %v1651_v32  ;;  %v1701_v43 = vadd.f32 %v1700_v39, %v1699_v33 }
 0x15f   : > { %v1654_v44 = vpop.f32.mrf.mxu0  ;;  %v1702_v45 = vpop.f32.mrf.mxu1 }
 0x160   : > { %v1040_v48 = vmax.f32 %v1008_v40, 0.0  ;;  %v1056_v49 = vmax.f32 %v1024_v41, 0.0  ;;  %v970_v50 = vmul.f32 %v1653_v42, %v2201_v51  ;;  %v986_v52 = vmul.f32 %v1701_v43, %v2201_v51 }
 0x161   : > { %v1655_v53 = vpop.f32.mrf.mxu0  ;;  %v1703_v54 = vpop.f32.mrf.mxu1 }
 0x162   : > { %v1531_v55 = vpack.c.bf16 %v1040_v48, %v1039_v46  ;;  %v1571_v56 = vpack.c.bf16 %v1056_v49, %v1055_v47  ;;  %v1656_v57 = vadd.f32 %v1655_v53, %v1654_v44  ;;  %v1704_v58 = vadd.f32 %v1703_v54, %v1702_v45 }
 0x163   : > { %v1009_v60 = vadd.f32 %v2208_v59, %v970_v50  ;;  %v1025_v61 = vadd.f32 %v2208_v59, %v986_v52 }
 0x164   : > { %1583 = vst [vmem:[%s2219_s9 + $0x30] sm:$0xff] %v1531_v55   ;;  %1591 = vst [vmem:[%s2219_s9 + $0x70] sm:$0xff] %v1571_v56   ;;  %v971_v62 = vmul.f32 %v1656_v57, %v2201_v51  ;;  %v987_v63 = vmul.f32 %v1704_v58, %v2201_v51 }
 0x165   : > { %v1041_v2 = vmax.f32 %v1009_v60, 0.0  ;;  %v1057_v3 = vmax.f32 %v1025_v61, 0.0 }
 0x166   : > { %v1010_v0 = vadd.f32 %v2208_v59, %v971_v62  ;;  %v1026_v1 = vadd.f32 %v2208_v59, %v987_v63 }
 0x168   : > { %v1042_v4 = vmax.f32 %v1010_v0, 0.0  ;;  %v1058_v5 = vmax.f32 %v1026_v1, 0.0 }
 0x16a   : > { %v1536_v51 = vpack.c.bf16 %v1042_v4, %v1041_v2  ;;  %v1576_v6 = vpack.c.bf16 %v1058_v5, %v1057_v3 }
 0x16c   : > { %1584 = vst [vmem:[%s2219_s9 + $0x38] sm:$0xff] %v1536_v51   ;;  %1592 = vst [vmem:[%s2219_s9 + $0x78] sm:$0xff] %v1576_v6  }
 0x16d   : > { %1931 = shalt.err (!%p1928_p3)
}
 0x16e   : > { %s1932_s6 = scalar_lea.hbm %s2294_s29, 2048  ;;  %s1936_s27 = scalar_lea.hbm %s2349_s4, 16384 }
 0x16f   : > { %p1933_p5 = scmp.ne.s32.totalorder %s2294_s29, %s1932_s6  ;;  %p1937_p6 = scmp.lt.s32.totalorder %s2294_s29, %s2349_s4 }
 0x170   : > { %p1938_p11 = scmp.lt.s32.totalorder %s1936_s27, %s1932_s6 }
 0x171   : > { %p1934_p7 = pnand %p1933_p5, %p2362_p4 }
 0x172   : > { %p1939_p10 = por %p1938_p11, %p1937_p6 }
 0x173   : > { %p1935_p9 = pneg %p1934_p7 }
 0x175   : > { %p1940_p1 = pnand %p1939_p10, %p1935_p9 }
 0x177   : > { %1943 = shalt.err (!%p1940_p1)
}
 0x178   : > { %s2011_s9 = smov 64   ;;  %s2012_s24 = smov 4  }
 0x179   : > { %1727 = dma.vmem_to_hbm [thread:$0]  (%p2362_p4), %s2296_s10, 2048, %s2294_s29, %s1220_s18, %s2011_s9, %s2011_s9, %s2012_s24  }
 0x17a PF: > { %p1744_p8 = scmp.ge.s32.totalorder %s2002_s20, 2  ;;  %s1249_s14 = sand.u32 1, %s1982_s15  }
 0x17b   : > { %p2363_p12 = scmp.ne.s32.totalorder %s2355_s26, 0  ;;  %s1250_s11 = scalar_lea.sflag [#allocation5], %s1249_s14 }
 0x17d   : > { %p1738_p13 = pnand %p1744_p8, %p2363_p12 }
 0x17f   : > { %p1739_p0 = pneg %p1738_p13 }
 0x181   : > { %1977 = dma.done.wait (%p1739_p0), %s1250_s11, 2048  }
 0x182   : > { %1979 = vsyncadd (%p1739_p0), %s1250_s11, 4294965248  ;;  %s21_s20 = sadd.s32 1, %s2002_s20   ;;  %s2364_s15 = smov %s1986_s16 }
 0x183   : > { %p18_p2 = scmp.ge.s32.totalorder %s21_s20, 10   ;;  %s2365_s16 = smov %s1990_s17 }
 0x184   : > { %s2366_s17 = smov %s2133_s28  ;;  %s2367_s18 = smov %s1998_s19 }
 0x185   : > { %s2368_s19 = smov %s2370_s5  ;;  %20 = sbr.rel (!%p18_p2) target bundleno = 9 (0x9), region = 100 }
 0x18a   :  { %1255 = vsyncpa [#allocation4], 1 }
 0x18b   :  { %1257 = vsyncpa [#allocation4 + $0x1], 1 }
 0x18c   :  { %1258 = vsyncpa [#allocation7], 1 }
 0x18d   :  { %1259 = vsyncpa [#allocation5], 1 }
 0x18e   :  { %1261 = vsyncpa [#allocation5 + $0x1], 1 }

</bundles_post_ra>
